<compile_context>
chip_gen: v6e
topology: v6e:2x2x1
jax: 0.10.0
libtpu: 0.0.40
codegen_flags: <defaults>
</compile_context>

<pallas_src>
import functools
import math

import jax
import jax.numpy as jnp
from jax.experimental import pallas as pl
from jax.experimental.pallas import tpu as pltpu


def _round_up(x, m):
    return (x + m - 1) // m * m


def _sphere_conv_kernel(x_ref, w_ref, b_ref, o_ref, *, lw, th):
    """One (batch, Ho-tile) step: 9 per-tap MXU dots accumulated in f32.

    x_ref: (1, 4, Cin_p, (th+2)*lw)  bf16 phase-split tile (1 halo row + 1 seam-slack row)
    w_ref: (9, Cout, Cin_p)          bf16 weights, tap-major k = ki*3 + kj
    b_ref: (Cout, 1)                 f32 bias
    o_ref: (1, Cout, th*lw)          f32 flattened output slab (seam column trimmed outside)
    """
    l = th * lw
    acc = None
    for ki in range(3):
        for kj in range(3):
            # Because the input is phase-split by the conv stride, each tap is a contiguous
            # static lane slice of one phase plane (no strided lane access, no concat).
            f = 2 * (ki % 2) + (kj % 2)              # phase plane (row parity, col parity)
            start = (ki // 2) * lw + (kj // 2)       # flat spatial offset of this tap
            tap = x_ref[0, f, :, start:start + l]    # (Cin_p, l) bf16
            d = jnp.dot(w_ref[ki * 3 + kj], tap,     # MXU, f32 accumulation
                        preferred_element_type=jnp.float32)
            acc = d if acc is None else acc + d
    o_ref[0] = (acc + b_ref[...]).astype(o_ref.dtype)


def _choose_th(ho, lw, cin_p, cout, budget_bytes):
    """Largest Ho tile whose double-buffered in+out blocks fit the budget.

    Prefers tiles whose flattened lane extent th*lw is a multiple of 128 (unmasked stores),
    then sublane multiples of 8, then anything.
    """
    def need(th):
        in_b = 4 * cin_p * (th + 2) * lw * 2      # bf16 phase-split halo tile
        out_b = cout * th * lw * 4                # f32 output slab
        return 2 * (in_b + out_b)                 # double buffering

    if need(ho) <= budget_bytes:
        return ho
    for step in (128 // math.gcd(lw, 128), 8, 1):
        th = (ho // step) * step
        while th >= step and need(th) > budget_bytes:
            th -= step
        if th >= step:
            return th
    # TODO(synk): a single output row does not fit the budget -> would also need W tiling.
    return ho


def sphere_conv2(x, w, b, *, block_budget_bytes=20 * 1024 * 1024):
    """SphereConv2 forward (npart=1): zero-pad by 1, Conv2d(k=3, s=2, p=0), identity trim.

    x: (N, Cin, H, W) float32   w: (Cout, Cin, 3, 3)   b: (Cout,)
    returns (N, Cout, Ho, Wo) float32 with Ho = (H-1)//2 + 1, Wo = (W-1)//2 + 1.
    """
    N, Cin, H, W = x.shape
    Cout = w.shape[0]
    Ho = (H - 1) // 2 + 1
    Wo = (W - 1) // 2 + 1
    Lw = Wo + 1                                  # phase-plane width (seam column trimmed later)

    Cin_p = _round_up(Cin, 16)                   # bf16 sublane tile

    TH = _choose_th(Ho, Lw, Cin_p, Cout, block_budget_bytes)
    num_t = -(-Ho // TH)
    Ho_p = TH * num_t                            # padded output rows (extra rows trimmed)
    Hph = Ho_p + 2                               # phase rows: +1 halo row, +1 seam slack row
    Hp = 2 * Hph                                 # padded input rows (PseudoPadV2(1) + align)
    Wp = 2 * Lw

    # --- one-time layout pass (XLA): bf16 cast + zero pad + space-to-depth by stride 2 ---
    xb = x.astype(jnp.bfloat16)
    xp = jnp.pad(xb, ((0, 0), (0, Cin_p - Cin), (1, Hp - H - 1), (1, Wp - W - 1)))
    xph = xp.reshape(N, Cin_p, Hph, 2, Lw, 2)
    xph = jnp.transpose(xph, (0, 3, 5, 1, 2, 4))          # (N, rowpar, colpar, C, hr, wc)
    xph = xph.reshape(N, 4, Cin_p, Hph, Lw)

    S_t = (TH + 2) * Lw
    if num_t == 1:
        xtiles = xph.reshape(N, 4, Cin_p, S_t)
    else:
        xtiles = jnp.stack(
            [xph[:, :, :, t * TH: t * TH + TH + 2, :] for t in range(num_t)], axis=1)
        xtiles = xtiles.reshape(N * num_t, 4, Cin_p, S_t)

    # Weights as (9, Cout, Cin_p) bf16, tap-major; zero-padded channels are numerically free.
    w_taps = jnp.transpose(w.astype(jnp.bfloat16), (2, 3, 0, 1)).reshape(9, Cout, Cin)
    w_taps = jnp.pad(w_taps, ((0, 0), (0, 0), (0, Cin_p - Cin)))
    b_col = b.astype(jnp.float32).reshape(Cout, 1)

    L_t = TH * Lw
    NT = N * num_t
    kernel = functools.partial(_sphere_conv_kernel, lw=Lw, th=TH)

    # VMEM limit from the chosen blocks (double-buffered in/out + weights + intermediates),
    # clamped to be safe on v7x's 64 MiB physical VMEM.
    in_block_b = 4 * Cin_p * S_t * 2
    out_block_b = Cout * L_t * 4
    w_bytes = 9 * Cout * Cin_p * 2
    vmem_need = 2 * (in_block_b + out_block_b) + w_bytes + 3 * out_block_b
    vmem_limit = int(min(max(vmem_need + (8 << 20), 32 << 20), 48 << 20))

    out_tiles = pl.pallas_call(
        kernel,
        out_shape=jax.ShapeDtypeStruct((NT, Cout, L_t), jnp.float32),
        grid=(NT,),
        in_specs=[
            pl.BlockSpec((1, 4, Cin_p, S_t), lambda g: (g, 0, 0, 0)),
            pl.BlockSpec((9, Cout, Cin_p), lambda g: (0, 0, 0)),
            pl.BlockSpec((Cout, 1), lambda g: (0, 0)),
        ],
        out_specs=pl.BlockSpec((1, Cout, L_t), lambda g: (g, 0, 0)),
        compiler_params=pltpu.CompilerParams(
            dimension_semantics=("parallel",),
            vmem_limit_bytes=vmem_limit,
        ),
        cost_estimate=pl.CostEstimate(
            flops=2 * NT * 9 * Cout * Cin_p * L_t,
            transcendentals=0,
            bytes_accessed=(xtiles.size * 2 + w_taps.size * 2 + b_col.size * 4
                            + NT * Cout * L_t * 4),
        ),
    )(xtiles, w_taps, b_col)

    # Undo tiling/flattening; drop the seam column (wo == Wo) and padded rows.
    # PseudoFillV2(0) is the identity for npart=1.
    out = out_tiles.reshape(N, num_t, Cout, TH, Lw)
    out = jnp.transpose(out, (0, 2, 1, 3, 4)).reshape(N, Cout, Ho_p, Lw)
    return out[:, :, :Ho, :Wo]


def _reference(x, w, b):
    """Spec reference: zero-pad 1 + nn.Conv2d(Cin, Cout, 3, stride=2, padding=0)."""
    xp = jnp.pad(x, ((0, 0), (0, 0), (1, 1), (1, 1)))
    y = jax.lax.conv_general_dilated(
        xp, w, window_strides=(2, 2), padding="VALID",
        dimension_numbers=("NCHW", "OIHW", "NCHW"),
        precision=jax.lax.Precision.HIGHEST)
    return y + b.reshape(1, -1, 1, 1)


if __name__ == "__main__":
    key = jax.random.PRNGKey(0)
    keys = jax.random.split(key, 6)

    def _check(N, Cin, Cout, H, W, kx, kw, kb):
        x = jax.random.normal(kx, (N, Cin, H, W), jnp.float32)
        w = 0.1 * jax.random.normal(kw, (Cout, Cin, 3, 3), jnp.float32)
        b = 0.1 * jax.random.normal(kb, (Cout,), jnp.float32)

        out = jax.jit(sphere_conv2)(x, w, b)
        jax.block_until_ready(out)

        Ho, Wo = (H - 1) // 2 + 1, (W - 1) // 2 + 1
        assert out.shape == (N, Cout, Ho, Wo), out.shape

        # Tight check (layout/indexing): reference with the same bf16 operand quantization.
        xq = x.astype(jnp.bfloat16).astype(jnp.float32)
        wq = w.astype(jnp.bfloat16).astype(jnp.float32)
        err_q = float(jnp.max(jnp.abs(out - _reference(xq, wq, b))))
        assert err_q < 2e-3, f"bf16-operand reference mismatch: {err_q}"

        # Loose check vs exact f32 reference (only bf16 quantization of x/w differs).
        err = float(jnp.max(jnp.abs(out - _reference(x, w, b))))
        assert err < 3e-2, f"f32 reference mismatch: {err}"

    _check(2, 4, 8, 16, 16, keys[0], keys[1], keys[2])   # even spatial sizes
    _check(2, 4, 8, 15, 13, keys[3], keys[4], keys[5])   # odd spatial sizes (seam/pad edges)

    print("KERNEL_OK")
</pallas_src>

<mosaic_0001>
module attributes {stable_mosaic.version = 11 : i64} {
  func.func @_sphere_conv_kernel(%arg0: i32, %arg1: memref<1x4x16x90xbf16, #tpu.memory_space<vmem>>, %arg2: memref<9x8x16xbf16, #tpu.memory_space<vmem>>, %arg3: memref<8x1xf32, #tpu.memory_space<vmem>>, %arg4: memref<1x8x72xf32, #tpu.memory_space<vmem>>) attributes {dimension_semantics = [#tpu.dimension_semantics<parallel>], iteration_bounds = array<i64: 2>, scalar_prefetch = 0 : i64, scratch_operands = 0 : i64, tpu.core_type = #tpu.core_type<tc>, window_params = [{transform_indices = @transform_0, window_bounds = array<i64: 1, 4, 16, 90>}, {pipeline_mode = #tpu.pipeline_mode<synchronous>, transform_indices = @transform_1, window_bounds = array<i64: 9, 8, 16>}, {pipeline_mode = #tpu.pipeline_mode<synchronous>, transform_indices = @transform_2, window_bounds = array<i64: 8, 1>}, {transform_indices = @transform_3, window_bounds = array<i64: 1, 8, 72>}]} {
    %c0 = arith.constant 0 : index
    %c0_0 = arith.constant 0 : index
    %c0_1 = arith.constant 0 : index
    %c0_2 = arith.constant 0 : index
    %0 = vector.load %arg1[%c0, %c0_0, %c0_1, %c0_2] : memref<1x4x16x90xbf16, #tpu.memory_space<vmem>>, vector<1x1x16x72xbf16>
    %1 = vector.shape_cast %0 : vector<1x1x16x72xbf16> to vector<16x72xbf16>
    %c0_3 = arith.constant 0 : index
    %c0_4 = arith.constant 0 : index
    %c0_5 = arith.constant 0 : index
    %2 = vector.load %arg2[%c0_3, %c0_4, %c0_5] : memref<9x8x16xbf16, #tpu.memory_space<vmem>>, vector<1x8x16xbf16>
    %3 = vector.shape_cast %2 : vector<1x8x16xbf16> to vector<8x16xbf16>
    %cst = arith.constant dense<0.000000e+00> : vector<8x72xf32>
    %4 = tpu.matmul %3, %1, %cst {dimension_numbers = #tpu.dot_dimension_numbers<[1], [0], [0], [1], [0, 0, 1, 1], [], []>} : vector<8x16xbf16>, vector<16x72xbf16>, vector<8x72xf32> -> vector<8x72xf32>
    %c0_6 = arith.constant 0 : index
    %c1 = arith.constant 1 : index
    %c0_7 = arith.constant 0 : index
    %c0_8 = arith.constant 0 : index
    %5 = vector.load %arg1[%c0_6, %c1, %c0_7, %c0_8] : memref<1x4x16x90xbf16, #tpu.memory_space<vmem>>, vector<1x1x16x72xbf16>
    %6 = vector.shape_cast %5 : vector<1x1x16x72xbf16> to vector<16x72xbf16>
    %c1_9 = arith.constant 1 : index
    %c0_10 = arith.constant 0 : index
    %c0_11 = arith.constant 0 : index
    %7 = vector.load %arg2[%c1_9, %c0_10, %c0_11] : memref<9x8x16xbf16, #tpu.memory_space<vmem>>, vector<1x8x16xbf16>
    %8 = vector.shape_cast %7 : vector<1x8x16xbf16> to vector<8x16xbf16>
    %cst_12 = arith.constant dense<0.000000e+00> : vector<8x72xf32>
    %9 = tpu.matmul %8, %6, %cst_12 {dimension_numbers = #tpu.dot_dimension_numbers<[1], [0], [0], [1], [0, 0, 1, 1], [], []>} : vector<8x16xbf16>, vector<16x72xbf16>, vector<8x72xf32> -> vector<8x72xf32>
    %10 = arith.addf %4, %9 : vector<8x72xf32>
    %c0_13 = arith.constant 0 : index
    %c0_14 = arith.constant 0 : index
    %c0_15 = arith.constant 0 : index
    %c1_16 = arith.constant 1 : index
    %11 = vector.load %arg1[%c0_13, %c0_14, %c0_15, %c1_16] : memref<1x4x16x90xbf16, #tpu.memory_space<vmem>>, vector<1x1x16x72xbf16>
    %12 = vector.shape_cast %11 : vector<1x1x16x72xbf16> to vector<16x72xbf16>
    %c2 = arith.constant 2 : index
    %c0_17 = arith.constant 0 : index
    %c0_18 = arith.constant 0 : index
    %13 = vector.load %arg2[%c2, %c0_17, %c0_18] : memref<9x8x16xbf16, #tpu.memory_space<vmem>>, vector<1x8x16xbf16>
    %14 = vector.shape_cast %13 : vector<1x8x16xbf16> to vector<8x16xbf16>
    %cst_19 = arith.constant dense<0.000000e+00> : vector<8x72xf32>
    %15 = tpu.matmul %14, %12, %cst_19 {dimension_numbers = #tpu.dot_dimension_numbers<[1], [0], [0], [1], [0, 0, 1, 1], [], []>} : vector<8x16xbf16>, vector<16x72xbf16>, vector<8x72xf32> -> vector<8x72xf32>
    %16 = arith.addf %10, %15 : vector<8x72xf32>
    %c0_20 = arith.constant 0 : index
    %c2_21 = arith.constant 2 : index
    %c0_22 = arith.constant 0 : index
    %c0_23 = arith.constant 0 : index
    %17 = vector.load %arg1[%c0_20, %c2_21, %c0_22, %c0_23] : memref<1x4x16x90xbf16, #tpu.memory_space<vmem>>, vector<1x1x16x72xbf16>
    %18 = vector.shape_cast %17 : vector<1x1x16x72xbf16> to vector<16x72xbf16>
    %c3 = arith.constant 3 : index
    %c0_24 = arith.constant 0 : index
    %c0_25 = arith.constant 0 : index
    %19 = vector.load %arg2[%c3, %c0_24, %c0_25] : memref<9x8x16xbf16, #tpu.memory_space<vmem>>, vector<1x8x16xbf16>
    %20 = vector.shape_cast %19 : vector<1x8x16xbf16> to vector<8x16xbf16>
    %cst_26 = arith.constant dense<0.000000e+00> : vector<8x72xf32>
    %21 = tpu.matmul %20, %18, %cst_26 {dimension_numbers = #tpu.dot_dimension_numbers<[1], [0], [0], [1], [0, 0, 1, 1], [], []>} : vector<8x16xbf16>, vector<16x72xbf16>, vector<8x72xf32> -> vector<8x72xf32>
    %22 = arith.addf %16, %21 : vector<8x72xf32>
    %c0_27 = arith.constant 0 : index
    %c3_28 = arith.constant 3 : index
    %c0_29 = arith.constant 0 : index
    %c0_30 = arith.constant 0 : index
    %23 = vector.load %arg1[%c0_27, %c3_28, %c0_29, %c0_30] : memref<1x4x16x90xbf16, #tpu.memory_space<vmem>>, vector<1x1x16x72xbf16>
    %24 = vector.shape_cast %23 : vector<1x1x16x72xbf16> to vector<16x72xbf16>
    %c4 = arith.constant 4 : index
    %c0_31 = arith.constant 0 : index
    %c0_32 = arith.constant 0 : index
    %25 = vector.load %arg2[%c4, %c0_31, %c0_32] : memref<9x8x16xbf16, #tpu.memory_space<vmem>>, vector<1x8x16xbf16>
    %26 = vector.shape_cast %25 : vector<1x8x16xbf16> to vector<8x16xbf16>
    %cst_33 = arith.constant dense<0.000000e+00> : vector<8x72xf32>
    %27 = tpu.matmul %26, %24, %cst_33 {dimension_numbers = #tpu.dot_dimension_numbers<[1], [0], [0], [1], [0, 0, 1, 1], [], []>} : vector<8x16xbf16>, vector<16x72xbf16>, vector<8x72xf32> -> vector<8x72xf32>
    %28 = arith.addf %22, %27 : vector<8x72xf32>
    %c0_34 = arith.constant 0 : index
    %c2_35 = arith.constant 2 : index
    %c0_36 = arith.constant 0 : index
    %c1_37 = arith.constant 1 : index
    %29 = vector.load %arg1[%c0_34, %c2_35, %c0_36, %c1_37] : memref<1x4x16x90xbf16, #tpu.memory_space<vmem>>, vector<1x1x16x72xbf16>
    %30 = vector.shape_cast %29 : vector<1x1x16x72xbf16> to vector<16x72xbf16>
    %c5 = arith.constant 5 : index
    %c0_38 = arith.constant 0 : index
    %c0_39 = arith.constant 0 : index
    %31 = vector.load %arg2[%c5, %c0_38, %c0_39] : memref<9x8x16xbf16, #tpu.memory_space<vmem>>, vector<1x8x16xbf16>
    %32 = vector.shape_cast %31 : vector<1x8x16xbf16> to vector<8x16xbf16>
    %cst_40 = arith.constant dense<0.000000e+00> : vector<8x72xf32>
    %33 = tpu.matmul %32, %30, %cst_40 {dimension_numbers = #tpu.dot_dimension_numbers<[1], [0], [0], [1], [0, 0, 1, 1], [], []>} : vector<8x16xbf16>, vector<16x72xbf16>, vector<8x72xf32> -> vector<8x72xf32>
    %34 = arith.addf %28, %33 : vector<8x72xf32>
    %c0_41 = arith.constant 0 : index
    %c0_42 = arith.constant 0 : index
    %c0_43 = arith.constant 0 : index
    %c9 = arith.constant 9 : index
    %35 = vector.load %arg1[%c0_41, %c0_42, %c0_43, %c9] : memref<1x4x16x90xbf16, #tpu.memory_space<vmem>>, vector<1x1x16x72xbf16>
    %36 = vector.shape_cast %35 : vector<1x1x16x72xbf16> to vector<16x72xbf16>
    %c6 = arith.constant 6 : index
    %c0_44 = arith.constant 0 : index
    %c0_45 = arith.constant 0 : index
    %37 = vector.load %arg2[%c6, %c0_44, %c0_45] : memref<9x8x16xbf16, #tpu.memory_space<vmem>>, vector<1x8x16xbf16>
    %38 = vector.shape_cast %37 : vector<1x8x16xbf16> to vector<8x16xbf16>
    %cst_46 = arith.constant dense<0.000000e+00> : vector<8x72xf32>
    %39 = tpu.matmul %38, %36, %cst_46 {dimension_numbers = #tpu.dot_dimension_numbers<[1], [0], [0], [1], [0, 0, 1, 1], [], []>} : vector<8x16xbf16>, vector<16x72xbf16>, vector<8x72xf32> -> vector<8x72xf32>
    %40 = arith.addf %34, %39 : vector<8x72xf32>
    %c0_47 = arith.constant 0 : index
    %c1_48 = arith.constant 1 : index
    %c0_49 = arith.constant 0 : index
    %c9_50 = arith.constant 9 : index
    %41 = vector.load %arg1[%c0_47, %c1_48, %c0_49, %c9_50] : memref<1x4x16x90xbf16, #tpu.memory_space<vmem>>, vector<1x1x16x72xbf16>
    %42 = vector.shape_cast %41 : vector<1x1x16x72xbf16> to vector<16x72xbf16>
    %c7 = arith.constant 7 : index
    %c0_51 = arith.constant 0 : index
    %c0_52 = arith.constant 0 : index
    %43 = vector.load %arg2[%c7, %c0_51, %c0_52] : memref<9x8x16xbf16, #tpu.memory_space<vmem>>, vector<1x8x16xbf16>
    %44 = vector.shape_cast %43 : vector<1x8x16xbf16> to vector<8x16xbf16>
    %cst_53 = arith.constant dense<0.000000e+00> : vector<8x72xf32>
    %45 = tpu.matmul %44, %42, %cst_53 {dimension_numbers = #tpu.dot_dimension_numbers<[1], [0], [0], [1], [0, 0, 1, 1], [], []>} : vector<8x16xbf16>, vector<16x72xbf16>, vector<8x72xf32> -> vector<8x72xf32>
    %46 = arith.addf %40, %45 : vector<8x72xf32>
    %c0_54 = arith.constant 0 : index
    %c0_55 = arith.constant 0 : index
    %c0_56 = arith.constant 0 : index
    %c10 = arith.constant 10 : index
    %47 = vector.load %arg1[%c0_54, %c0_55, %c0_56, %c10] : memref<1x4x16x90xbf16, #tpu.memory_space<vmem>>, vector<1x1x16x72xbf16>
    %48 = vector.shape_cast %47 : vector<1x1x16x72xbf16> to vector<16x72xbf16>
    %c8 = arith.constant 8 : index
    %c0_57 = arith.constant 0 : index
    %c0_58 = arith.constant 0 : index
    %49 = vector.load %arg2[%c8, %c0_57, %c0_58] : memref<9x8x16xbf16, #tpu.memory_space<vmem>>, vector<1x8x16xbf16>
    %50 = vector.shape_cast %49 : vector<1x8x16xbf16> to vector<8x16xbf16>
    %cst_59 = arith.constant dense<0.000000e+00> : vector<8x72xf32>
    %51 = tpu.matmul %50, %48, %cst_59 {dimension_numbers = #tpu.dot_dimension_numbers<[1], [0], [0], [1], [0, 0, 1, 1], [], []>} : vector<8x16xbf16>, vector<16x72xbf16>, vector<8x72xf32> -> vector<8x72xf32>
    %52 = arith.addf %46, %51 : vector<8x72xf32>
    %c0_60 = arith.constant 0 : index
    %c0_61 = arith.constant 0 : index
    %53 = vector.load %arg3[%c0_60, %c0_61] : memref<8x1xf32, #tpu.memory_space<vmem>>, vector<8x1xf32>
    %54 = vector.broadcast %53 : vector<8x1xf32> to vector<8x72xf32>
    %55 = arith.addf %52, %54 : vector<8x72xf32>
    %c0_62 = arith.constant 0 : index
    %c0_63 = arith.constant 0 : index
    %c0_64 = arith.constant 0 : index
    %56 = vector.load %arg4[%c0_62, %c0_63, %c0_64] : memref<1x8x72xf32, #tpu.memory_space<vmem>>, vector<1x8x72xf32>
    %57 = vector.shape_cast %56 : vector<1x8x72xf32> to vector<8x72xf32>
    %58 = vector.shape_cast %55 : vector<8x72xf32> to vector<1x8x72xf32>
    tpu.vector_store %arg4[%c0_62, %c0_63, %c0_64], %58 {strides = array<i32>} : memref<1x8x72xf32, #tpu.memory_space<vmem>>, vector<1x8x72xf32>,
    return
  }
  func.func @transform_0(%arg0: i32) -> (i32, i32, i32, i32) {
    %c0_i32 = arith.constant 0 : i32
    %c0_i32_0 = arith.constant 0 : i32
    %c0_i32_1 = arith.constant 0 : i32
    %c0_i32_2 = arith.constant 0 : i32
    return %arg0, %c0_i32, %c0_i32_0, %c0_i32_1 : i32, i32, i32, i32
  }
  func.func @transform_1(%arg0: i32) -> (i32, i32, i32) {
    %c0_i32 = arith.constant 0 : i32
    %c0_i32_0 = arith.constant 0 : i32
    %c0_i32_1 = arith.constant 0 : i32
    %c0_i32_2 = arith.constant 0 : i32
    return %c0_i32, %c0_i32_0, %c0_i32_1 : i32, i32, i32
  }
  func.func @transform_2(%arg0: i32) -> (i32, i32) {
    %c0_i32 = arith.constant 0 : i32
    %c0_i32_0 = arith.constant 0 : i32
    %c0_i32_1 = arith.constant 0 : i32
    return %c0_i32, %c0_i32_0 : i32, i32
  }
  func.func @transform_3(%arg0: i32) -> (i32, i32, i32) {
    %c0_i32 = arith.constant 0 : i32
    %c0_i32_0 = arith.constant 0 : i32
    %c0_i32_1 = arith.constant 0 : i32
    return %arg0, %c0_i32, %c0_i32_0 : i32, i32, i32
  }
}

</mosaic_0001>

<bundles_post_ra>
// kernel: sphere_conv2.1
= control target key start
LH: loop header
LB: loop body
LE: loop exit
PB: predicated region body
PF: predicated region fallthrough
CT: control target
= control target key end

     0   :  { %s858_s12 = smov 0   ;;  %s951_s0 = inlined_call_operand.vmem [shape: bf16[2,4,16,90], index: 0, kind: input, shape index: {}]   ;;  %s952_s1 = inlined_call_operand.vmem [shape: bf16[9,8,16], index: 1, kind: input, shape index: {}]   ;;  %s953_s2 = inlined_call_operand.vmem [shape: f32[8,1], index: 2, kind: input, shape index: {}]   ;;  %s954_s3 = inlined_call_operand.vmem [shape: f32[2,8,72], index: 3, kind: output, shape index: {}]  }
   0x1 LB: > { %s694_s13 = sadd.s32 4294967295, %s830_s12   ;;  %p698_p0 = scmp.ge.s32.totalorder %s830_s12, 1  ;;  %s830_s12 = sphi %s858_s12, %s13_s12  }
   0x2   : > { %p137_p1 = scmp.lt.s32.totalorder %s830_s12, 3 }
   0x4   : > { %p138_p2 = pnand %p698_p0, %p137_p1 }
   0x5   : > { %p160_p3 = scmp.lt.s32.totalorder (!%p138_p2), %s694_s13, 1  ;;  %s834_s18 = smov (!%p138_p2), 127  }
   0x6   : > { %141 = sbr.rel (%p138_p2) target bundleno = 356 (0x164), region = 32  ;;  %s835_s19 = smov (!%p138_p2), 119  }
   0x7   : > { %s836_s24 = smov (!%p138_p2), 118  }
   0xb   : > { %v832_v0 = vmov 0.0   ;;  %vm833_vm0 = vmmov 0   ;;  %s956_s13 = smov (!%p160_p3, %s694_s13), 1  ;;  %v172_v4 = vld [vmem:[%s952_s1] sm:$0xf]  ;;  %vm184_vm1 = vcmask 130048  }
   0xc   : > { %750 = vmatprep.subr.bf16.mxu0 %v832_v0  ;;  %752 = vmatprep.mubr.msk.bf16.mxu0 %vm833_vm0, %v832_v0  ;;  %s731_s14 = sshll.u32 %s956_s13, 5  ;;  %v704_v5 = vld [vmem:[%s952_s1 + $0x4] sm:$0xf]  ;;  %v713_v6 = vld [vmem:[%s952_s1 + $0xc] sm:$0xf]  ;;  %v837_v8 = vmov 0  }
   0xd   : > { %756 = vmatprep.subr.bf16.mxu1 %v832_v0  ;;  %758 = vmatprep.mubr.msk.bf16.mxu1 %vm833_vm0, %v832_v0  ;;  %s878_s17 = scalar_lea.vmem %s951_s0, %s731_s14  ;;  %v632_v7 = vld [vmem:[%s953_s2] sm:$0xff]  ;;  %v709_v10 = vld [vmem:[%s952_s1 + $0x8] sm:$0xf]  ;;  %v721_v14 = vld [vmem:[%s952_s1 + $0x14] sm:$0xf]  ;;  %s701_s16 = sshll.u32 %s956_s13, 3 }
   0xe   : > { %v820_v1 = vld [vmem:[%s878_s17] sm:$0xff]   ;;  %v821_v2 = vld [vmem:[%s878_s17 + $0x10] sm:$0xff]   ;;  %v822_v3 = vld [vmem:[%s878_s17 + $0x8] sm:$0xff]   ;;  %818 = vset.pattern.permute.xlu1 %v837_v8  ;;  %819 = vset.pattern.permute.xlu0 %v837_v8  ;;  %vm639_vm2 = vcmask 588800  }
   0xf   : > { %279 = vrot.lane.b32.xlu0 %v820_v1, %s834_s18  ;;  %487 = vrot.lane.b32.xlu1 %v820_v1, %s835_s19  ;;  %v823_v11 = vld [vmem:[%s878_s17 + $0x18] sm:$0xff]   ;;  %v718_v16 = vld [vmem:[%s952_s1 + $0x10] sm:$0xf] }
  0x10   : > { %757 = vmatpush3.bf16.msra.mxu1 %v820_v1  ;;  %751 = vmatpush3.bf16.msra.mxu0 %v822_v3  ;;  %v725_v17 = vld [vmem:[%s952_s1 + $0x1c] sm:$0xf]  ;;  %v723_v18 = vld [vmem:[%s952_s1 + $0x18] sm:$0xf]  ;;  %v727_v20 = vld [vmem:[%s952_s1 + $0x20] sm:$0xf] }
  0x11   : > { %768 = vmatprep.subr.bf16.mxu1 %v832_v0  ;;  %762 = vmatprep.subr.bf16.mxu0 %v832_v0 }
  0x13   : > { %438 = vrot.lane.b32.xlu0 %v821_v2, %s834_s18  ;;  %536 = vrot.lane.b32.xlu1 %v822_v3, %s835_s19  ;;  %s168_s19 = scalar_lea.vmem %s954_s3, %s701_s16 }
  0x14   : > { %759 = vmatmul.mubr.msk.bf16.vlgmr.msra.gmra.mxu1 %vm184_vm1, %v172_v4  ;;  %753 = vmatmul.mubr.msk.bf16.vlgmr.msra.gmra.mxu0 %vm184_vm1, %v704_v5 }
  0x15   : > { %769 = vmatpush3.bf16.msra.mxu1 %v821_v2  ;;  %764 = vmatprep.mubr.msk.bf16.mxu0 %vm833_vm0, %v832_v0 }
  0x16   : > { %770 = vmatprep.mubr.msk.bf16.mxu1 %vm833_vm0, %v832_v0  ;;  %780 = vmatprep.subr.bf16.mxu1 %v832_v0 }
  0x17   : > { %585 = vrot.lane.b32.xlu0 %v820_v1, %s836_s24  ;;  %635 = vperm.xlu1 %818, %v632_v7  }
  0x1c   : > { %771 = vmatmul.mubr.msk.bf16.vlgmr.msra.gmra.mxu1 %vm184_vm1, %v713_v6 }
  0x1d   : > { %782 = vmatprep.mubr.msk.bf16.mxu1 %vm833_vm0, %v832_v0 }
  0x81   : > { %v280_v9 = vpop.permute.xlu0 %279  ;;  %v488_v12 = vpop.permute.xlu1 %487 }
  0x82   : > { %763 = vmatpush3.bf16.msra.mxu0 %v280_v9 }
  0x83   : > { %774 = vmatprep.subr.bf16.mxu0 %v832_v0 }
  0x85   : > { %765 = vmatmul.mubr.msk.bf16.vlgmr.msra.gmra.mxu0 %vm184_vm1, %v709_v10  ;;  %v439_v13 = vpop.permute.xlu0 %438  ;;  %v537_v15 = vpop.permute.xlu1 %536 }
  0x86   : > { %775 = vmatpush3.bf16.msra.mxu0 %v823_v11  ;;  %776 = vmatprep.mubr.msk.bf16.mxu0 %vm833_vm0, %v832_v0 }
  0x87   : > { %781 = vmatpush3.bf16.msra.mxu1 %v439_v13  ;;  %786 = vmatprep.subr.bf16.mxu0 %v832_v0 }
  0x88   : > { %792 = vmatprep.subr.bf16.mxu1 %v832_v0 }
  0x89   : > { %v586_v19 = vpop.permute.xlu0 %585 }
  0x8a   : > { %783 = vmatmul.mubr.msk.bf16.vlgmr.msra.gmra.mxu1 %vm184_vm1, %v721_v14 }
  0x8b   : > { %793 = vmatpush3.bf16.msra.mxu1 %v537_v15  ;;  %794 = vmatprep.mubr.msk.bf16.mxu1 %vm833_vm0, %v832_v0 }
  0x8d   : > { %777 = vmatmul.mubr.msk.bf16.vlgmr.msra.gmra.mxu0 %vm184_vm1, %v718_v16 }
  0x8e   : > { %787 = vmatpush3.bf16.msra.mxu0 %v488_v12  ;;  %788 = vmatprep.mubr.msk.bf16.mxu0 %vm833_vm0, %v832_v0 }
  0x8f   : > { %798 = vmatprep.subr.bf16.mxu0 %v832_v0 }
  0x92   : > { %795 = vmatmul.mubr.msk.bf16.vlgmr.msra.gmra.mxu1 %vm184_vm1, %v725_v17  ;;  %v636_v61 = vpop.permute.xlu1 %635 }
  0x95   : > { %789 = vmatmul.mubr.msk.bf16.vlgmr.msra.gmra.mxu0 %vm184_vm1, %v723_v18 }
  0x96   : > { %799 = vmatpush3.bf16.msra.mxu0 %v586_v19  ;;  %800 = vmatprep.mubr.msk.bf16.mxu0 %vm833_vm0, %v832_v0 }
  0x9d   : > { %801 = vmatmul.mubr.msk.bf16.vlgmr.msra.gmra.mxu0 %vm184_vm1, %v727_v20 }
  0xd4   : > { %v271_v21 = vpop.f32.mrf.mxu1  ;;  %v222_v22 = vpop.f32.mrf.mxu0 }
  0xd5   : > { %v272_v23 = vadd.f32 %v271_v21, %v222_v22 }
  0xd6   : > { %v760_v24 = vpop.f32.mrf.mxu1  ;;  %v754_v25 = vpop.f32.mrf.mxu0 }
  0xd8   : > { %v274_v26 = vpop.f32.mrf.mxu1  ;;  %v225_v27 = vpop.f32.mrf.mxu0 }
  0xda   : > { %v761_v28 = vpop.f32.mrf.mxu1  ;;  %v755_v29 = vpop.f32.mrf.mxu0 }
  0xdc   : > { %v374_v30 = vpop.f32.mrf.mxu1 }
  0xde   : > { %v772_v31 = vpop.f32.mrf.mxu1 }
  0xe0   : > { %v377_v32 = vpop.f32.mrf.mxu1 }
  0xe2   : > { %v773_v33 = vpop.f32.mrf.mxu1 }
 0x145   : > { %v319_v34 = vpop.f32.mrf.mxu0 }
 0x146   : > { %v325_v39 = vadd.f32 %v319_v34, %v272_v23 }
 0x147   : > { %v766_v35 = vpop.f32.mrf.mxu0 }
 0x148   : > { %v380_v44 = vadd.f32 %v374_v30, %v325_v39 }
 0x149   : > { %v322_v36 = vpop.f32.mrf.mxu0 }
 0x14a   : > { %v478_v37 = vpop.f32.mrf.mxu1 }
 0x14b   : > { %v767_v38 = vpop.f32.mrf.mxu0 }
 0x14c   : > { %v784_v40 = vpop.f32.mrf.mxu1 }
 0x14d   : > { %v429_v41 = vpop.f32.mrf.mxu0 }
 0x14e   : > { %v481_v42 = vpop.f32.mrf.mxu1  ;;  %v435_v47 = vadd.f32 %v429_v41, %v380_v44 }
 0x14f   : > { %v778_v43 = vpop.f32.mrf.mxu0 }
 0x150   : > { %v785_v45 = vpop.f32.mrf.mxu1  ;;  %v484_v52 = vadd.f32 %v478_v37, %v435_v47 }
 0x151   : > { %v432_v46 = vpop.f32.mrf.mxu0 }
 0x152   : > { %v576_v48 = vpop.f32.mrf.mxu1 }
 0x153   : > { %v779_v49 = vpop.f32.mrf.mxu0 }
 0x154   : > { %v796_v50 = vpop.f32.mrf.mxu1 }
 0x155   : > { %v527_v51 = vpop.f32.mrf.mxu0 }
 0x156   : > { %v579_v53 = vpop.f32.mrf.mxu1  ;;  %v533_v55 = vadd.f32 %v527_v51, %v484_v52 }
 0x157   : > { %v790_v54 = vpop.f32.mrf.mxu0 }
 0x158   : > { %v797_v56 = vpop.f32.mrf.mxu1  ;;  %v582_v59 = vadd.f32 %v576_v48, %v533_v55 }
 0x159   : > { %v530_v57 = vpop.f32.mrf.mxu0 }
 0x15b   : > { %v791_v58 = vpop.f32.mrf.mxu0 }
 0x15d   : > { %v625_v60 = vpop.f32.mrf.mxu0 }
 0x15e   : > { %v631_v62 = vadd.f32 %v625_v60, %v582_v59 }
 0x15f   : > { %v802_v63 = vpop.f32.mrf.mxu0 }
 0x160   : > { %v638_v0 = vadd.f32 %v636_v61, %v631_v62 }
 0x161   : > { %v628_v1 = vpop.f32.mrf.mxu0 }
 0x162   : > { %640 = vst.msk [vmem:[%s168_s19] sm:$0xff] %vm639_vm2, %v638_v0 }
 0x163   : > { %v803_v2 = vpop.f32.mrf.mxu0 }
 0x164 PF: > { %s13_s12 = sadd.s32 1, %s830_s12  }
 0x165   : > { %p10_p4 = scmp.ge.s32.totalorder %s13_s12, 4  }
 0x167   :  { %12 = sbr.rel (!%p10_p4) target bundleno = 1 (0x1), region = 73 }

</bundles_post_ra>
